<compile_context>
chip_gen: v6e
topology: v6e:2x2x1
jax: 0.10.0
libtpu: 0.0.40
codegen_flags: <defaults>
</compile_context>

<pallas_src>
import jax
import jax.numpy as jnp
from jax.experimental import pallas as pl
from jax.experimental.pallas import tpu as pltpu


def _round_up(x, m):
    return (x + m - 1) // m * m


def _vmem_capacity_bytes():
    """Physical VMEM per core (v5e/v6e: 128 MiB, v7x: 64 MiB per TC)."""
    try:
        return int(pltpu.get_tpu_info().vmem_capacity_bytes)
    except Exception:
        pass
    try:
        kind = jax.devices()[0].device_kind.lower()
        return (64 << 20) if "v7" in kind else (128 << 20)
    except Exception:
        return 64 << 20  # conservative default: fits every generation


def _mxu_lane_multiple():
    """256 on the 2x256x256-MXU generations (v6e/v7x), else 128."""
    try:
        kind = jax.devices()[0].device_kind.lower()
    except Exception:
        return 128
    return 256 if ("v6" in kind or "v7" in kind or "trillium" in kind) else 128


def _generation_tiles(vmem_cap):
    """(row_tile, hidden_tile) starting points per generation.

    v7x  (64 MiB/TC): tm=512, th=512  (~512 FLOP/B, compute-bound, fits 64 MiB)
    v5e/v6e (128 MiB): tm=512, th=1024 (above both HBM rooflines)
    """
    if vmem_cap <= (80 << 20):
        return 512, 512
    return 512, 1024


# ---------------------------------------------------------------------------
# Kernels
# ---------------------------------------------------------------------------
def _ffn_kernel_out_acc(x_ref, w1_ref, b1_ref, w2_ref, b2_ref, o_ref):
    """One (row-tile, hidden-tile) step; the f32 output block IS the accumulator.

    x_ref:(tm,E) input dtype  w1_ref:(E,th) cdt  b1_ref:(1,th) f32
    w2_ref:(th,E) cdt         b2_ref:(1,E) f32   o_ref:(tm,E) f32 (resident over k)
    """
    k = pl.program_id(1)
    x = x_ref[...].astype(w1_ref.dtype)               # MXU operand dtype (bf16 default)
    h = jnp.dot(x, w1_ref[...], preferred_element_type=jnp.float32) + b1_ref[...]
    a = jnp.maximum(h, 0.0).astype(w2_ref.dtype)      # explicit cast for fc2 MXU
    contrib = jnp.dot(a, w2_ref[...], preferred_element_type=jnp.float32)

    @pl.when(k == 0)
    def _():
        o_ref[...] = b2_ref[...] + contrib

    @pl.when(k > 0)
    def _():
        o_ref[...] += contrib


def _ffn_kernel_scratch_acc(x_ref, w1_ref, b1_ref, w2_ref, b2_ref, o_ref, acc_ref):
    """Same as above, but with a persistent f32 scratch (non-f32 outputs)."""
    k = pl.program_id(1)
    x = x_ref[...].astype(w1_ref.dtype)
    h = jnp.dot(x, w1_ref[...], preferred_element_type=jnp.float32) + b1_ref[...]
    a = jnp.maximum(h, 0.0).astype(w2_ref.dtype)
    contrib = jnp.dot(a, w2_ref[...], preferred_element_type=jnp.float32)

    @pl.when(k == 0)
    def _():
        acc_ref[...] = b2_ref[...] + contrib

    @pl.when(k > 0)
    def _():
        acc_ref[...] += contrib

    @pl.when(k == pl.num_programs(1) - 1)
    def _():
        o_ref[...] = acc_ref[...].astype(o_ref.dtype)


# ---------------------------------------------------------------------------
# Wrappers
# ---------------------------------------------------------------------------
def prepare_params(w1, b1, w2, b2, *, compute_dtype=jnp.bfloat16, hidden_tile=None):
    """Cast + pad the FFN weights ONCE (cache the result; don't redo per call).

    w1:[E,H] b1:[H] w2:[H,E] b2:[E]. Returns a dict for `feed_forward_prepared`.
    compute_dtype is the MXU operand dtype (accumulation is always f32);
    bfloat16 is the default — float32 operands are several times slower on the
    MXU of every generation and double the weight DMA traffic.
    """
    E, H = w1.shape
    assert w2.shape == (H, E) and b1.shape == (H,) and b2.shape == (E,)
    cdt = jnp.dtype(compute_dtype)
    cb = cdt.itemsize
    vmem_cap = _vmem_capacity_bytes()
    budget = int(vmem_cap * 0.9)
    lane = _mxu_lane_multiple()

    E_p = _round_up(E, lane)
    H_lane = _round_up(H, lane)
    _, th = _generation_tiles(vmem_cap)
    if hidden_tile is not None:
        th = _round_up(hidden_tile, 128)

    if 2 * E_p * H_lane * cb <= min(12 << 20, budget // 4):
        # Small-model fast path: both padded weights stay VMEM-resident; the
        # hidden axis collapses to a single grid step so the weights are DMA'd
        # exactly once per call (their block index never changes).
        th = H_lane
    else:
        th = min(th, H_lane)
        # Keep double-buffered W1+W2 tiles within ~half the VMEM budget.
        while th > 128 and 4 * E_p * th * cb > budget // 2:
            th = _round_up(max(128, th // 2), 128)
    H_p = _round_up(H, th)

    w1_p = jnp.pad(w1.astype(cdt), ((0, E_p - E), (0, H_p - H)))
    w2_p = jnp.pad(w2.astype(cdt), ((0, H_p - H), (0, E_p - E)))
    b1_p = jnp.pad(b1.astype(jnp.float32), (0, H_p - H)).reshape(1, H_p)
    b2_p = jnp.pad(b2.astype(jnp.float32), (0, E_p - E)).reshape(1, E_p)
    return dict(w1=w1_p, b1=b1_p, w2=w2_p, b2=b2_p,
                E=E, H=H, E_p=E_p, H_p=H_p, th=th, cdt=cdt)


def feed_forward_prepared(x, params, *, tm=None, vmem_limit_bytes=None,
                          weight_buffers=None):
    """Fused relu(x@W1+b1)@W2+b2 using pre-padded/pre-cast weights."""
    E, E_p, H_p, th, cdt = (params["E"], params["E_p"], params["H_p"],
                            params["th"], params["cdt"])
    assert x.shape[-1] == E
    lead = x.shape[:-1]
    x2 = x.reshape(-1, E)
    M = x2.shape[0]
    out_dtype = x.dtype
    f32_out = (out_dtype == jnp.float32)
    xb = jnp.dtype(x.dtype).itemsize
    cb = cdt.itemsize
    ob = jnp.dtype(out_dtype).itemsize

    vmem_cap = _vmem_capacity_bytes()
    budget = int(vmem_cap * 0.9)
    if tm is None:
        tm, _ = _generation_tiles(vmem_cap)
    tm = _round_up(tm, 8)
    tm_eff = min(tm, _round_up(M, 8))

    def footprint(t):
        f = (2 * t * E_p * xb                     # x tiles (double-buffered)
             + 4 * E_p * th * cb                  # W1 + W2 tiles (double-buffered)
             + 16 * th * 4 + 16 * E_p * 4         # bias tiles (sublane-padded)
             + 2 * t * E_p * ob)                  # output tiles
        if not f32_out:
            f += t * E_p * 4                      # f32 accumulator scratch
        return f

    while tm_eff > 8 and footprint(tm_eff) > budget - (2 << 20):
        tm_eff = _round_up(max(8, tm_eff // 2), 8)

    # Keep >=2 row tiles when possible so the "parallel" M axis can be split
    # across v7x's two TensorCores (harmless on single-TC generations).
    if M > 8 and _round_up(M, tm_eff) // tm_eff < 2:
        tm_eff = _round_up(-(-M // 2), 8)

    M_p = _round_up(M, tm_eff)
    n_row = M_p // tm_eff
    n_k = H_p // th

    if M_p != M or E_p != E:
        x2 = jnp.pad(x2, ((0, M_p - M), (0, E_p - E)))

    if vmem_limit_bytes is None:
        vmem_limit_bytes = budget
    vmem_limit_bytes = int(min(vmem_limit_bytes, vmem_cap - (2 << 20)))

    weight_bytes = 2 * E_p * H_p * cb
    weight_passes = 1 if n_k == 1 else n_row      # resident when single k step
    cost = pl.CostEstimate(
        flops=4 * M_p * E_p * H_p,                # two matmuls, 2*M*E*H each
        transcendentals=0,
        bytes_accessed=int(M_p * E_p * (xb + ob)
                           + weight_passes * (weight_bytes + (H_p + E_p) * 4)),
    )

    w_kw = {} if weight_buffers is None else {"pipeline_mode": pl.Buffered(weight_buffers)}
    in_specs = [
        pl.BlockSpec((tm_eff, E_p), lambda i, k: (i, 0)),          # x rows
        pl.BlockSpec((E_p, th), lambda i, k: (0, k), **w_kw),      # W1 tile
        pl.BlockSpec((1, th), lambda i, k: (0, k)),                # b1 tile
        pl.BlockSpec((th, E_p), lambda i, k: (k, 0), **w_kw),      # W2 tile
        pl.BlockSpec((1, E_p), lambda i, k: (0, 0)),               # b2
    ]

    if f32_out:
        kernel = _ffn_kernel_out_acc
        scratch = ()
    else:
        kernel = _ffn_kernel_scratch_acc
        scratch = (pltpu.VMEM((tm_eff, E_p), jnp.float32),)

    out2 = pl.pallas_call(
        kernel,
        out_shape=jax.ShapeDtypeStruct((M_p, E_p), out_dtype),
        grid_spec=pltpu.PrefetchScalarGridSpec(
            num_scalar_prefetch=0,
            grid=(n_row, n_k),
            in_specs=in_specs,
            out_specs=pl.BlockSpec((tm_eff, E_p), lambda i, k: (i, 0)),
            scratch_shapes=scratch,
        ),
        compiler_params=pltpu.CompilerParams(
            dimension_semantics=("parallel", "arbitrary"),
            vmem_limit_bytes=vmem_limit_bytes,
        ),
        cost_estimate=cost,
    )(x2, params["w1"], params["b1"], params["w2"], params["b2"])

    return out2[:M, :E].reshape(*lead, E)


def feed_forward(x, w1, b1, w2, b2, *, tm=None, hidden_tile=None,
                 compute_dtype=jnp.bfloat16, vmem_limit_bytes=None,
                 weight_buffers=None):
    """Fused FFN: relu(x @ w1 + b1) @ w2 + b2 ; x:[...,E] -> [...,E].

    NOTE: this convenience wrapper re-casts/pads W1/W2 every call (one extra
    HBM pass over the weights). On a hot path call `prepare_params` once,
    cache the result, and use `feed_forward_prepared`.
    """
    params = prepare_params(w1, b1, w2, b2, compute_dtype=compute_dtype,
                            hidden_tile=hidden_tile)
    return feed_forward_prepared(x, params, tm=tm,
                                 vmem_limit_bytes=vmem_limit_bytes,
                                 weight_buffers=weight_buffers)


def init_params(key, embed_dim, hidden_dim, dtype=jnp.float32):
    """Deterministic init mimicking nn.Linear (uniform in +/- 1/sqrt(fan_in))."""
    k1, k2, k3, k4 = jax.random.split(key, 4)
    bound1 = 1.0 / (embed_dim ** 0.5)
    bound2 = 1.0 / (hidden_dim ** 0.5)
    # stored as [in, out] (transpose of PyTorch's [out, in])
    w1 = jax.random.uniform(k1, (embed_dim, hidden_dim), dtype, -bound1, bound1)
    b1 = jax.random.uniform(k2, (hidden_dim,), dtype, -bound1, bound1)
    w2 = jax.random.uniform(k3, (hidden_dim, embed_dim), dtype, -bound2, bound2)
    b2 = jax.random.uniform(k4, (embed_dim,), dtype, -bound2, bound2)
    return w1, b1, w2, b2


if __name__ == "__main__":
    key = jax.random.PRNGKey(0)
    kx, kp, kx2, kp2 = jax.random.split(key, 4)

    # Small shapes consistent with FeedForward(embed_dim=32, hidden_dim=64).
    B, S, E, H = 2, 8, 32, 64
    x = jax.random.normal(kx, (B, S, E), jnp.float32)
    w1, b1, w2, b2 = init_params(kp, E, H)

    # Exact-f32 MXU path (strict-ish check).
    out = jax.block_until_ready(
        feed_forward(x, w1, b1, w2, b2, compute_dtype=jnp.float32))
    with jax.default_matmul_precision("highest"):
        ref = (jnp.maximum(x.reshape(-1, E) @ w1 + b1, 0.0) @ w2 + b2
               ).reshape(B, S, E)
    assert out.shape == (B, S, E)
    err = float(jnp.max(jnp.abs(out - ref)))
    assert jnp.allclose(out, ref, atol=2e-3, rtol=2e-3), err

    # Default bf16-MXU path through pre-prepared (cast+padded once) weights.
    B2, S2, E2, H2 = 2, 64, 128, 256
    x_b = jax.random.normal(kx2, (B2, S2, E2), jnp.float32)
    p_raw = init_params(kp2, E2, H2)
    p_prepped = prepare_params(*p_raw)          # bf16 default; do this ONCE
    out_b = jax.block_until_ready(feed_forward_prepared(x_b, p_prepped))
    with jax.default_matmul_precision("highest"):
        ref_b = (jnp.maximum(x_b.reshape(-1, E2) @ p_raw[0] + p_raw[1], 0.0)
                 @ p_raw[2] + p_raw[3]).reshape(B2, S2, E2)
    err_b = float(jnp.max(jnp.abs(out_b - ref_b)))
    assert jnp.allclose(out_b, ref_b, atol=8e-2, rtol=8e-2), err_b

    print("KERNEL_OK")
</pallas_src>

<mosaic_0001>
module attributes {stable_mosaic.version = 11 : i64} {
  func.func @_ffn_kernel_out_acc(%arg0: i32, %arg1: i32, %arg2: memref<8x128xf32, #tpu.memory_space<vmem>>, %arg3: memref<128x128xf32, #tpu.memory_space<vmem>>, %arg4: memref<1x128xf32, #tpu.memory_space<vmem>>, %arg5: memref<128x128xf32, #tpu.memory_space<vmem>>, %arg6: memref<1x128xf32, #tpu.memory_space<vmem>>, %arg7: memref<8x128xf32, #tpu.memory_space<vmem>>) attributes {dimension_semantics = [#tpu.dimension_semantics<parallel>, #tpu.dimension_semantics<arbitrary>], iteration_bounds = array<i64: 2, 1>, scalar_prefetch = 0 : i64, scratch_operands = 0 : i64, tpu.core_type = #tpu.core_type<tc>, window_params = [{transform_indices = @transform_0, window_bounds = array<i64: 8, 128>}, {transform_indices = @transform_1, window_bounds = array<i64: 128, 128>}, {transform_indices = @transform_2, window_bounds = array<i64: 1, 128>}, {transform_indices = @transform_3, window_bounds = array<i64: 128, 128>}, {pipeline_mode = #tpu.pipeline_mode<synchronous>, transform_indices = @transform_4, window_bounds = array<i64: 1, 128>}, {transform_indices = @transform_5, window_bounds = array<i64: 8, 128>}]} {
    %c0 = arith.constant 0 : index
    %c0_0 = arith.constant 0 : index
    %0 = vector.load %arg2[%c0, %c0_0] : memref<8x128xf32, #tpu.memory_space<vmem>>, vector<8x128xf32>
    %c0_1 = arith.constant 0 : index
    %c0_2 = arith.constant 0 : index
    %1 = vector.load %arg3[%c0_1, %c0_2] : memref<128x128xf32, #tpu.memory_space<vmem>>, vector<128x128xf32>
    %cst = arith.constant dense<0.000000e+00> : vector<8x128xf32>
    %2 = tpu.matmul %0, %1, %cst {dimension_numbers = #tpu.dot_dimension_numbers<[1], [0], [0], [1], [0, 0, 1, 1], [], []>} : vector<8x128xf32>, vector<128x128xf32>, vector<8x128xf32> -> vector<8x128xf32>
    %c0_3 = arith.constant 0 : index
    %c0_4 = arith.constant 0 : index
    %3 = vector.load %arg4[%c0_3, %c0_4] : memref<1x128xf32, #tpu.memory_space<vmem>>, vector<1x128xf32>
    %4 = vector.broadcast %3 : vector<1x128xf32> to vector<8x128xf32>
    %5 = arith.addf %2, %4 : vector<8x128xf32>
    %cst_5 = arith.constant 0.000000e+00 : f32
    %6 = vector.broadcast %cst_5 : f32 to vector<8x128xf32>
    %7 = arith.maximumf %5, %6 : vector<8x128xf32>
    %c0_6 = arith.constant 0 : index
    %c0_7 = arith.constant 0 : index
    %8 = vector.load %arg5[%c0_6, %c0_7] : memref<128x128xf32, #tpu.memory_space<vmem>>, vector<128x128xf32>
    %cst_8 = arith.constant dense<0.000000e+00> : vector<8x128xf32>
    %9 = tpu.matmul %7, %8, %cst_8 {dimension_numbers = #tpu.dot_dimension_numbers<[1], [0], [0], [1], [0, 0, 1, 1], [], []>} : vector<8x128xf32>, vector<128x128xf32>, vector<8x128xf32> -> vector<8x128xf32>
    %c0_i32 = arith.constant 0 : i32
    %10 = arith.cmpi eq, %arg1, %c0_i32 : i32
    %11 = arith.extui %10 : i1 to i32
    %c0_i32_9 = arith.constant 0 : i32
    %12 = arith.cmpi ne, %11, %c0_i32_9 : i32
    scf.if %12 {
      %c0_12 = arith.constant 0 : index
      %c0_13 = arith.constant 0 : index
      %16 = vector.load %arg6[%c0_12, %c0_13] : memref<1x128xf32, #tpu.memory_space<vmem>>, vector<1x128xf32>
      %17 = vector.broadcast %16 : vector<1x128xf32> to vector<8x128xf32>
      %18 = arith.addf %17, %9 : vector<8x128xf32>
      %c0_14 = arith.constant 0 : index
      %c0_15 = arith.constant 0 : index
      %19 = vector.load %arg7[%c0_14, %c0_15] : memref<8x128xf32, #tpu.memory_space<vmem>>, vector<8x128xf32>
      tpu.vector_store %arg7[%c0_14, %c0_15], %18 {strides = array<i32>} : memref<8x128xf32, #tpu.memory_space<vmem>>, vector<8x128xf32>,
    } else {
    }
    %c0_i32_10 = arith.constant 0 : i32
    %13 = arith.cmpi sgt, %arg1, %c0_i32_10 : i32
    %14 = arith.extui %13 : i1 to i32
    %c0_i32_11 = arith.constant 0 : i32
    %15 = arith.cmpi ne, %14, %c0_i32_11 : i32
    scf.if %15 {
      %c0_12 = arith.constant 0 : index
      %c0_13 = arith.constant 0 : index
      %16 = vector.load %arg7[%c0_12, %c0_13] : memref<8x128xf32, #tpu.memory_space<vmem>>, vector<8x128xf32>
      %17 = arith.addf %16, %9 : vector<8x128xf32>
      %c0_14 = arith.constant 0 : index
      %c0_15 = arith.constant 0 : index
      %18 = vector.load %arg7[%c0_14, %c0_15] : memref<8x128xf32, #tpu.memory_space<vmem>>, vector<8x128xf32>
      tpu.vector_store %arg7[%c0_14, %c0_15], %17 {strides = array<i32>} : memref<8x128xf32, #tpu.memory_space<vmem>>, vector<8x128xf32>,
    } else {
    }
    return
  }
  func.func @transform_0(%arg0: i32, %arg1: i32) -> (i32, i32) {
    %c0_i32 = arith.constant 0 : i32
    %c0_i32_0 = arith.constant 0 : i32
    return %arg0, %c0_i32 : i32, i32
  }
  func.func @transform_1(%arg0: i32, %arg1: i32) -> (i32, i32) {
    %c0_i32 = arith.constant 0 : i32
    %c0_i32_0 = arith.constant 0 : i32
    return %c0_i32, %arg1 : i32, i32
  }
  func.func @transform_2(%arg0: i32, %arg1: i32) -> (i32, i32) {
    %c0_i32 = arith.constant 0 : i32
    %c0_i32_0 = arith.constant 0 : i32
    return %c0_i32, %arg1 : i32, i32
  }
  func.func @transform_3(%arg0: i32, %arg1: i32) -> (i32, i32) {
    %c0_i32 = arith.constant 0 : i32
    %c0_i32_0 = arith.constant 0 : i32
    return %arg1, %c0_i32 : i32, i32
  }
  func.func @transform_4(%arg0: i32, %arg1: i32) -> (i32, i32) {
    %c0_i32 = arith.constant 0 : i32
    %c0_i32_0 = arith.constant 0 : i32
    %c0_i32_1 = arith.constant 0 : i32
    return %c0_i32, %c0_i32_0 : i32, i32
  }
  func.func @transform_5(%arg0: i32, %arg1: i32) -> (i32, i32) {
    %c0_i32 = arith.constant 0 : i32
    %c0_i32_0 = arith.constant 0 : i32
    return %arg0, %c0_i32 : i32, i32
  }
}

</mosaic_0001>

<bundles_post_ra>
// kernel: tpu_custom_call.1
= control target key start
LH: loop header
LB: loop body
LE: loop exit
PB: predicated region body
PF: predicated region fallthrough
CT: control target
= control target key end

     0   :  { %s1281_s0 = inlined_call_operand.hbm [shape: f32[16,128], index: 0, kind: input, shape index: {}]   ;;  %s1282_s1 = inlined_call_operand.hbm [shape: f32[128,128], index: 1, kind: input, shape index: {}]   ;;  %s1283_s2 = inlined_call_operand.vmem [shape: f32[1,128], index: 2, kind: input, shape index: {}]   ;;  %s1284_s3 = inlined_call_operand.hbm [shape: f32[128,128], index: 3, kind: input, shape index: {}]   ;;  %s1285_s4 = inlined_call_operand.vmem [shape: f32[1,128], index: 4, kind: input, shape index: {}]   ;;  %s1286_s5 = inlined_call_operand.hbm [shape: f32[16,128], index: 5, kind: output, shape index: {}]  }
   0x1   :  { %1290 = sst [smem:[#allocation12_spill]] %s1282_s1 }
   0x2   :  { %10 = vsyncpa [#allocation3], 0 }
   0x3   :  { %12 = vsyncpa [#allocation3 + $0x1], 0 }
   0x4   :  { %13 = vsyncpa [#allocation6], 0 }
   0x5   :  { %14 = vsyncpa [#allocation4], 0 }
   0x6   :  { %16 = vsyncpa [#allocation4 + $0x1], 0  ;;  %s1054_s18 = smov 0   ;;  %s1056_s19 = smov 0  }
   0x7   :  { %s1058_s20 = smov 0   ;;  %s1060_s21 = smov 0  }
   0x8   :  { %s1062_s22 = smov 0   ;;  %s1064_s23 = smov 0  }
   0x9 LB: > { %s639_s24 = sadd.s32 4294967295, %s1014_s23   ;;  %s640_s25 = sadd.s32 4294967294, %s1014_s23   ;;  %s1014_s23 = sphi %s1064_s23, %s22_s23   ;;  %s1010_s22 = sphi %s1062_s22, %s1308_s22   ;;  %s1006_s21 = sphi %s1060_s21, %s1307_s21   ;;  %s1002_s20 = sphi %s1058_s20, %s1306_s20   ;;  %s998_s19 = sphi %s1056_s19, %s1305_s19   ;;  %s994_s18 = sphi %s1054_s18, %s1304_s18  }
   0xa   : > { %p54_p0 = scmp.ne.s32.totalorder %s998_s19, %s994_s18  ;;  %p1088_p1 = scmp.eq.s32.totalorder %s639_s24, 0 }
   0xb   : > { %p1092_p2 = scmp.eq.s32.totalorder %s639_s24, 1  ;;  %p183_p3 = scmp.eq.s32.totalorder %s640_s25, 1 }
   0xc   : > { %s1291_s26 = scalar_select %p1088_p1, 1, 0 }
   0xd   : > { %p1098_p4 = por %p1088_p1, %p54_p0  ;;  %p641_p5 = scmp.ge.s32.totalorder %s1014_s23, 1 }
   0xe   : > { %p1103_p6 = por %p183_p3, %p54_p0  ;;  %p190_p7 = scmp.lt.s32.totalorder %s1014_s23, 3 }
   0xf   : > { %s1293_s28 = scalar_select %p1098_p4, 1, 0 }
  0x10   : > { %s1294_s29 = scalar_select %p1103_p6, 1, 0 }
  0x11   : > { %p1108_p8 = pnand %p641_p5, %p190_p7  ;;  %s1016_s6 = smov [#allocation5]  }
  0x12   : > { %s204_s7 = sshll.u32 %s1016_s6, 4  ;;  %s1017_s9 = smov [#allocation7]   ;;  %s205_s7 = int_to_ptr.vmem [resolvable:$true] %s204_s7 }
  0x13   : > { %p775_p9 = pneg %p1108_p8  ;;  %s226_s10 = sshll.u32 %s1017_s9, 4  ;;  %s227_s10 = int_to_ptr.vmem [resolvable:$true] %s226_s10 }
  0x14   : > { %s861_s11 = scalar_lea.vmem %s205_s7, 2048  ;;  %p869_p5 = scmp.lt.s32.totalorder %s205_s7, %s205_s7 }
  0x15   : > { %p1117_p11 = pnand %p775_p9, %p1088_p1  ;;  %p862_p13 = scmp.ne.s32.totalorder %s205_s7, %s861_s11 }
  0x16   : > { %p870_p7 = scmp.lt.s32.totalorder %s861_s11, %s861_s11 }
  0x17   : > { %p852_p12 = pneg %p1117_p11 }
  0x18   : > { %p871_p10 = por %p870_p7, %p869_p5 }
  0x19   : > { %p864_p0 = pnand %p862_p13, %p852_p12 }
  0x1b   : > { %p865_p3 = pneg %p864_p0 }
  0x1d   : > { %p872_p9 = pnand %p871_p10, %p865_p3 }
  0x1f   : > { %875 = shalt.err (!%p872_p9)
}
  0x20   : > { %s1018_s12 = smov 128   ;;  %s1019_s13 = smov 8  }
  0x21   : > { %s1297_s1 = sld [smem:[#allocation12_spill]]  ;;  %s887_s16 = scalar_lea.vmem %s227_s10, 2048 }
  0x22   : > { %p888_p6 = scmp.ne.s32.totalorder %s227_s10, %s887_s16  ;;  %p895_p1 = scmp.lt.s32.totalorder %s227_s10, %s227_s10 }
  0x23   : > { %p896_p4 = scmp.lt.s32.totalorder %s887_s16, %s887_s16 }
  0x24   : > { %p890_p13 = pnand %p888_p6, %p852_p12 }
  0x25   : > { %p897_p5 = por %p896_p4, %p895_p1 }
  0x26   : > { %p891_p0 = pneg %p890_p13 }
  0x27   : > { %778 = dma.hbm_to_vmem [thread:$0]  (!%p1117_p11), %s1297_s1, 2048, %s205_s7, [#allocation6], %s1018_s12, %s1018_s12, %s1019_s13  }
  0x28   : > { %p898_p10 = pnand %p897_p5, %p891_p0 }
  0x2a   : > { %901 = shalt.err (!%p898_p10)
}
  0x2b   : > { %781 = dma.hbm_to_vmem [thread:$0]  (!%p1117_p11), %s1284_s3, 2048, %s227_s10, [#allocation6], %s1018_s12, %s1018_s12, %s1019_s13  }
  0x2c   : > { %s34_s25 = sadd.s32 1, %s1010_s22  ;;  %s41_s6 = sadd.s32 1, %s1002_s20 }
  0x2d   : > { %p36_p1 = scmp.ge.s32.totalorder %s34_s25, 2  ;;  %p48_p4 = scmp.ne.s32.totalorder %s1002_s20, %s998_s19 }
  0x2e   : > { %p49_p6 = scmp.eq.s32.totalorder %s1014_s23, 0  ;;  %p792_p12 = scmp.lt.s32.totalorder %s1014_s23, 2 }
  0x2f   : > { %s1310_s25 = smov (%p36_p1, %s34_s25), 0  ;;  %p1149_p7 = por %p1092_p2, %p48_p4 }
  0x30   : > { %p50_p3 = por %p49_p6, %p48_p4  ;;  %s38_s8 = ssub.s32 %s1010_s22, %s1310_s25 }
  0x31   : > { %s243_s9 = sand.u32 1, %s1002_s20   ;;  %p39_p9 = scmp.eq.s32.totalorder %s38_s8, 0 }
  0x32   : > { %s646_s10 = sshll.u32 %s243_s9, 3  ;;  %s647_s11 = sshll.u32 %s1010_s22, 7 }
  0x33   : > { %s1158_s12 = scalar_select %p39_p9, %s1002_s20, %s41_s6  }
  0x34   : > { %s252_s15 = scalar_lea.hbm %s1281_s0, %s647_s11  ;;  %s247_s16 = scalar_lea.vmem [#allocation2], %s646_s10 }
  0x35   : > { %s254_s17 = sshll.u32 %s247_s16, 4  ;;  %p1165_p11 = pnand %p792_p12, %p50_p3  ;;  %s255_s17 = int_to_ptr.vmem [resolvable:$true] %s254_s17 }
  0x36   : > { %s244_s24 = scalar_lea.sflag [#allocation3], %s243_s9  ;;  %s915_s8 = scalar_lea.vmem %s255_s17, 128 }
  0x37   : > { %p904_p2 = pneg %p1165_p11  ;;  %p916_p13 = scmp.ne.s32.totalorder %s255_s17, %s915_s8 }
  0x38   : > { %s1020_s6 = smov [#allocation2]  }
  0x39   : > { %p918_p0 = pnand %p916_p13, %p904_p2  ;;  %s920_s1 = sshll.u32 %s1020_s6, 4  ;;  %s921_s1 = int_to_ptr.vmem [resolvable:$false] %s920_s1 }
  0x3a   : > { %s922_s11 = scalar_lea.vmem %s921_s1, 256  ;;  %p923_p10 = scmp.lt.s32.totalorder %s255_s17, %s921_s1 }
  0x3b   : > { %p919_p5 = pneg %p918_p0  ;;  %p924_p1 = scmp.lt.s32.totalorder %s922_s11, %s915_s8 }
  0x3d   : > { %p925_p4 = por %p924_p1, %p923_p10 }
  0x3f   : > { %p926_p6 = pnand %p925_p4, %p919_p5 }
  0x41   : > { %929 = shalt.err (!%p926_p6)
}
  0x42   : > { %785 = dma.hbm_to_vmem [thread:$0]  (!%p1165_p11), %s252_s15, 128, %s255_s17, %s244_s24  }
  0x43   : > { %263 = sbr.rel (%p1108_p8) target bundleno = 515 (0x203), region = 40  ;;  %s1176_s9 = sand.u32 (!%p1108_p8), 1, %s998_s19  }
  0x44   : > { %s649_s10 = sshll.u32 (!%p1108_p8), %s1176_s9, 3  ;;  %s266_s13 = scalar_lea.sflag (!%p1108_p8), [#allocation3], %s1176_s9 }
  0x45   : > { %s1182_s1 = scalar_lea.vmem (!%p1108_p8), [#allocation2], %s649_s10  ;;  %p1300_p12 = scmp.ne.s32.totalorder (!%p1108_p8), %s1293_s28, 0 }
  0x48   : > { %981 = dma.done.wait (%p1300_p12), %s266_s13, 128  }
  0x49   : > { %983 = vsyncadd (%p1300_p12), %s266_s13, 4294967168  ;;  %p1301_p3 = scmp.ne.s32.totalorder %s1291_s26, 0 }
  0x4b   : > { %985 = dma.done.wait (%p1301_p3), [#allocation6], 4096  }
  0x4c   : > { %987 = vsyncadd (%p1301_p3), [#allocation6], 4294963200  ;;  %v1021_v0 = vmov 0.0   ;;  %vm1022_vm0 = vmmov 0   ;;  %v327_v1 = vld [vmem:[#allocation5 + $0x78] sm:$0xff]  ;;  %v326_v2 = vld [vmem:[#allocation5 + $0x70] sm:$0xff] }
  0x4d   : > { %693 = vmatprep.subr.mxu0 %v1021_v0  ;;  %725 = vmatprep.mubr.msk.f32.mxu0 %vm1022_vm0, %v1021_v0  ;;  %v325_v3 = vld [vmem:[#allocation5 + $0x68] sm:$0xff]  ;;  %v324_v4 = vld [vmem:[#allocation5 + $0x60] sm:$0xff]  ;;  %v421_v5 = vld [vmem:[#allocation7 + $0x78] sm:$0xff]  ;;  %s656_s15 = sshll.u32 %s1006_s21, 7  ;;  %s306_s16 = scalar_lea.vmem [#allocation8], %s649_s10 }
  0x4e   : > { %728 = vmatprep.subr.mxu1 %v1021_v0  ;;  %760 = vmatprep.mubr.msk.f32.mxu1 %vm1022_vm0, %v1021_v0  ;;  %v323_v6 = vld [vmem:[#allocation5 + $0x58] sm:$0xff]  ;;  %v420_v7 = vld [vmem:[#allocation7 + $0x70] sm:$0xff]  ;;  %v419_v8 = vld [vmem:[#allocation7 + $0x68] sm:$0xff]  ;;  %s526_s17 = sshll.u32 %s306_s16, 4  ;;  %s1239_s8 = scalar_lea.hbm %s1286_s5, %s656_s15  ;;  %s527_s17 = int_to_ptr.vmem [resolvable:$true] %s526_s17 }
  0x4f   : > { %694 = vmatpush3.msra.mxu0 %v327_v1  ;;  %729 = vmatpush3.msra.mxu1 %v421_v5  ;;  %v322_v9 = vld [vmem:[#allocation5 + $0x50] sm:$0xff]  ;;  %v418_v10 = vld [vmem:[#allocation7 + $0x60] sm:$0xff]  ;;  %v321_v11 = vld [vmem:[#allocation5 + $0x48] sm:$0xff]  ;;  %s513_s6 = scalar_lea.sflag [#allocation4], %s1176_s9  ;;  %s930_s11 = scalar_lea.vmem %s527_s17, 128 }
  0x50   : > { %695 = vmatprep.subr.mxu0 %v1021_v0  ;;  %730 = vmatprep.subr.mxu1 %v1021_v0  ;;  %v417_v12 = vld [vmem:[#allocation7 + $0x58] sm:$0xff]  ;;  %v320_v13 = vld [vmem:[#allocation5 + $0x40] sm:$0xff]  ;;  %v416_v14 = vld [vmem:[#allocation7 + $0x50] sm:$0xff]  ;;  %p931_p8 = scmp.ne.s32.totalorder %s527_s17, %s930_s11  ;;  %s1023_s21 = smov [#allocation8]  }
  0x51   : > { %696 = vmatpush3.msra.mxu0 %v326_v2  ;;  %731 = vmatpush3.msra.mxu1 %v420_v7  ;;  %v319_v15 = vld [vmem:[#allocation5 + $0x38] sm:$0xff]  ;;  %v415_v16 = vld [vmem:[#allocation7 + $0x48] sm:$0xff]  ;;  %v318_v17 = vld [vmem:[#allocation5 + $0x30] sm:$0xff]  ;;  %s934_s13 = sshll.u32 %s1023_s21, 4  ;;  %s935_s13 = int_to_ptr.vmem [resolvable:$false] %s934_s13 }
  0x52   : > { %697 = vmatprep.subr.mxu0 %v1021_v0  ;;  %732 = vmatprep.subr.mxu1 %v1021_v0  ;;  %v414_v18 = vld [vmem:[#allocation7 + $0x40] sm:$0xff]  ;;  %v317_v19 = vld [vmem:[#allocation5 + $0x28] sm:$0xff]  ;;  %v413_v20 = vld [vmem:[#allocation7 + $0x38] sm:$0xff]  ;;  %p932_p9 = pnand %p931_p8, %p1149_p7  ;;  %s936_s10 = scalar_lea.vmem %s935_s13, 256 }
  0x53   : > { %698 = vmatpush3.msra.mxu0 %v325_v3  ;;  %733 = vmatpush3.msra.mxu1 %v419_v8  ;;  %v316_v21 = vld [vmem:[#allocation5 + $0x20] sm:$0xff]  ;;  %v412_v22 = vld [vmem:[#allocation7 + $0x30] sm:$0xff]  ;;  %v315_v23 = vld [vmem:[#allocation5 + $0x18] sm:$0xff]  ;;  %p937_p2 = scmp.lt.s32.totalorder %s527_s17, %s935_s13  ;;  %p938_p13 = scmp.lt.s32.totalorder %s936_s10, %s930_s11 }
  0x54   : > { %699 = vmatprep.subr.mxu0 %v1021_v0  ;;  %734 = vmatprep.subr.mxu1 %v1021_v0  ;;  %v411_v24 = vld [vmem:[#allocation7 + $0x28] sm:$0xff]  ;;  %v314_v25 = vld [vmem:[#allocation5 + $0x10] sm:$0xff]  ;;  %v410_v26 = vld [vmem:[#allocation7 + $0x20] sm:$0xff]  ;;  %p933_p11 = pneg %p932_p9 }
  0x55   : > { %700 = vmatpush3.msra.mxu0 %v324_v4  ;;  %735 = vmatpush3.msra.mxu1 %v418_v10  ;;  %v313_v27 = vld [vmem:[#allocation5 + $0x8] sm:$0xff]  ;;  %v409_v28 = vld [vmem:[#allocation7 + $0x18] sm:$0xff]  ;;  %v312_v29 = vld [vmem:[#allocation5] sm:$0xff]  ;;  %p939_p0 = por %p938_p13, %p937_p2 }
  0x56   : > { %701 = vmatprep.subr.mxu0 %v1021_v0  ;;  %736 = vmatprep.subr.mxu1 %v1021_v0  ;;  %v311_v30 = vld [vmem:[%s1182_s1] sm:$0xff]  ;;  %v407_v32 = vld [vmem:[#allocation7 + $0x8] sm:$0xff]  ;;  %v406_v33 = vld [vmem:[#allocation7] sm:$0xff] }
  0x57   : > { %702 = vmatpush3.msra.mxu0 %v323_v6  ;;  %737 = vmatpush3.msra.mxu1 %v417_v12  ;;  %v408_v31 = vld [vmem:[#allocation7 + $0x10] sm:$0xff]  ;;  %p940_p5 = pnand %p939_p0, %p933_p11 }
  0x58   : > { %703 = vmatprep.subr.mxu0 %v1021_v0  ;;  %738 = vmatprep.subr.mxu1 %v1021_v0  ;;  %v653_v34 = vld [vmem:[%s1283_s2] ss:$0 sm:$0xff] }
  0x59   : > { %704 = vmatpush3.msra.mxu0 %v322_v9  ;;  %739 = vmatpush3.msra.mxu1 %v416_v14  ;;  %v654_v39 = vld [vmem:[%s1285_s4] ss:$0 sm:$0xff] }
  0x5a   : > { %705 = vmatprep.subr.mxu0 %v1021_v0  ;;  %740 = vmatprep.subr.mxu1 %v1021_v0 }
  0x5b   : > { %706 = vmatpush3.msra.mxu0 %v321_v11  ;;  %741 = vmatpush3.msra.mxu1 %v415_v16 }
  0x5c   : > { %707 = vmatprep.subr.mxu0 %v1021_v0  ;;  %742 = vmatprep.subr.mxu1 %v1021_v0 }
  0x5d   : > { %708 = vmatpush3.msra.mxu0 %v320_v13  ;;  %743 = vmatpush3.msra.mxu1 %v414_v18 }
  0x5e   : > { %709 = vmatprep.subr.mxu0 %v1021_v0  ;;  %744 = vmatprep.subr.mxu1 %v1021_v0 }
  0x5f   : > { %710 = vmatpush3.msra.mxu0 %v319_v15  ;;  %745 = vmatpush3.msra.mxu1 %v413_v20 }
  0x60   : > { %711 = vmatprep.subr.mxu0 %v1021_v0  ;;  %746 = vmatprep.subr.mxu1 %v1021_v0 }
  0x61   : > { %712 = vmatpush3.msra.mxu0 %v318_v17  ;;  %747 = vmatpush3.msra.mxu1 %v412_v22 }
  0x62   : > { %713 = vmatprep.subr.mxu0 %v1021_v0  ;;  %748 = vmatprep.subr.mxu1 %v1021_v0 }
  0x63   : > { %714 = vmatpush3.msra.mxu0 %v317_v19  ;;  %749 = vmatpush3.msra.mxu1 %v411_v24 }
  0x64   : > { %715 = vmatprep.subr.mxu0 %v1021_v0  ;;  %750 = vmatprep.subr.mxu1 %v1021_v0 }
  0x65   : > { %716 = vmatpush3.msra.mxu0 %v316_v21  ;;  %751 = vmatpush3.msra.mxu1 %v410_v26 }
  0x66   : > { %717 = vmatprep.subr.mxu0 %v1021_v0  ;;  %752 = vmatprep.subr.mxu1 %v1021_v0 }
  0x67   : > { %718 = vmatpush3.msra.mxu0 %v315_v23  ;;  %753 = vmatpush3.msra.mxu1 %v409_v28 }
  0x68   : > { %719 = vmatprep.subr.mxu0 %v1021_v0  ;;  %754 = vmatprep.subr.mxu1 %v1021_v0 }
  0x69   : > { %720 = vmatpush3.msra.mxu0 %v314_v25  ;;  %755 = vmatpush3.msra.mxu1 %v408_v31 }
  0x6a   : > { %721 = vmatprep.subr.mxu0 %v1021_v0  ;;  %756 = vmatprep.subr.mxu1 %v1021_v0 }
  0x6b   : > { %722 = vmatpush3.msra.mxu0 %v313_v27  ;;  %757 = vmatpush3.msra.mxu1 %v407_v32 }
  0x6c   : > { %723 = vmatprep.subr.mxu0 %v1021_v0  ;;  %758 = vmatprep.subr.mxu1 %v1021_v0 }
  0x6d   : > { %724 = vmatpush3.msra.mxu0 %v312_v29  ;;  %759 = vmatpush3.msra.mxu1 %v406_v33 }
  0x6e   : > { %726 = vmatmul.mubr.f32.vlgmr.msra.gmra.mxu0 %v311_v30 }
 0x12e   : > { %v401_v35 = vpop.f32.mrf.mxu0 }
 0x12f   : > { %v402_v36 = vadd.f32 %v653_v34, %v401_v35 }
 0x130   : > { %v727_v37 = vpop.f32.mrf.mxu0 }
 0x131   : > { %v405_v38 = vmax.f32 %v402_v36, 0.0 }
 0x133   : > { %761 = vmatmul.mubr.f32.vlgmr.msra.gmra.mxu1 %v405_v38 }
 0x1f3   : > { %v488_v40 = vpop.f32.mrf.mxu1 }
 0x1f4   : > { %v503_v41 = vadd.f32 %v654_v39, %v488_v40 }
 0x1f5   : > { %v762_v42 = vpop.f32.mrf.mxu1 }
 0x1f6   : > { %504 = vst [vmem:[%s306_s16] sm:$0xff] %v503_v41 }
 0x1f7   : > { %943 = shalt.err (!%p940_p5)
}
 0x1f8   : > { %s944_s1 = scalar_lea.hbm %s1239_s8, 128  ;;  %s948_s28 = scalar_lea.hbm %s1286_s5, 256 }
 0x1f9   : > { %p945_p10 = scmp.ne.s32.totalorder %s1239_s8, %s944_s1  ;;  %p949_p6 = scmp.lt.s32.totalorder %s1239_s8, %s1286_s5 }
 0x1fa   : > { %p950_p12 = scmp.lt.s32.totalorder %s948_s28, %s944_s1 }
 0x1fb   : > { %p946_p1 = pnand %p945_p10, %p1149_p7 }
 0x1fc   : > { %p951_p3 = por %p950_p12, %p949_p6 }
 0x1fd   : > { %p947_p4 = pneg %p946_p1 }
 0x1ff   : > { %p952_p8 = pnand %p951_p3, %p947_p4 }
 0x201   : > { %955 = shalt.err (!%p952_p8)
}
 0x202   : > { %773 = dma.vmem_to_hbm [thread:$0]  (%p1149_p7), %s527_s17, 128, %s1239_s8, %s513_s6  }
 0x203 PF: > { %s538_s15 = sand.u32 1, %s994_s18   ;;  %p1302_p9 = scmp.ne.s32.totalorder %s1294_s29, 0 }
 0x204   : > { %p1303_p11 = scmp.ge.s32.totalorder %s1014_s23, 2  ;;  %s539_s16 = scalar_lea.sflag [#allocation4], %s538_s15 }
 0x206   : > { %p787_p2 = pnand %p1303_p11, %p1302_p9 }
 0x208   : > { %p788_p13 = pneg %p787_p2 }
 0x20a   : > { %989 = dma.done.wait (%p788_p13), %s539_s16, 128  }
 0x20b   : > { %991 = vsyncadd (%p788_p13), %s539_s16, 4294967168  ;;  %s22_s23 = sadd.s32 1, %s1014_s23   ;;  %s1304_s18 = smov %s998_s19 }
 0x20c   : > { %p19_p0 = scmp.ge.s32.totalorder %s22_s23, 4   ;;  %s1305_s19 = smov %s1002_s20 }
 0x20d   : > { %s1306_s20 = smov %s1158_s12  ;;  %s1307_s21 = smov %s1010_s22 }
 0x20e   : > { %s1308_s22 = smov %s1310_s25  ;;  %21 = sbr.rel (!%p19_p0) target bundleno = 9 (0x9), region = 106 }
 0x213   :  { %544 = vsyncpa [#allocation3], 1 }
 0x214   :  { %546 = vsyncpa [#allocation3 + $0x1], 1 }
 0x215   :  { %547 = vsyncpa [#allocation6], 1 }
 0x216   :  { %548 = vsyncpa [#allocation4], 1 }
 0x217   :  { %550 = vsyncpa [#allocation4 + $0x1], 1 }

</bundles_post_ra>
